<compile_context>
chip_gen: v7x
topology: tpu7x:2x2x1
jax: 0.10.0
libtpu: 0.0.40
codegen_flags: <defaults>
</compile_context>

<pallas_src>
import functools
import math

import jax
import jax.numpy as jnp
from jax import lax
from jax.experimental import pallas as pl
from jax.experimental.pallas import tpu as pltpu


def _sdpa_kernel(q_ref, k_ref, v_ref, ctx_ref, attn_ref,
                 qs_scr, m_scr, l_scr, acc_scr, mblk_scr,
                 *, scale, block_k, num_k_blocks, lk_valid, mask_keys,
                 mxu_dtype):
    # q_ref:    (1, tq, Dk)   Q tile (resident across ki)
    # k_ref:    (1, tk, Dk)   K tile
    # v_ref:    (1, tk, Dv)   V tile
    # ctx_ref:  (1, tq, Dv)   output, revisited across ki
    # attn_ref: (1, tq, Lk_pad) output, revisited across ki (prob slab)
    # qs_scr:   (tq, Dk)      scaled Q (hoisted out of the ki loop)
    # m/l:      (tq, 1) f32   running max / denom
    # acc:      (tq, Dv) f32  context accumulator
    # mblk:     (tq, nk) f32  per-K-tile running max (for finalize rescale)
    ki = pl.program_id(2)

    @pl.when(ki == 0)
    def _init():
        qs_scr[...] = (q_ref[0] * scale).astype(qs_scr.dtype)
        m_scr[...] = jnp.full_like(m_scr, -jnp.inf)
        l_scr[...] = jnp.zeros_like(l_scr)
        acc_scr[...] = jnp.zeros_like(acc_scr)

    q = qs_scr[...]                              # (tq, Dk)
    k = k_ref[0].astype(mxu_dtype)               # (tk, Dk)
    v = v_ref[0].astype(mxu_dtype)               # (tk, Dv)

    # scores: contract last dims directly (no explicit K transpose).
    s = lax.dot_general(
        q, k,
        dimension_numbers=(((1,), (1,)), ((), ())),
        preferred_element_type=jnp.float32,
    )                                            # (tq, tk) f32

    if mask_keys:
        col = ki * block_k + lax.broadcasted_iota(jnp.int32, s.shape, 1)
        s = jnp.where(col < lk_valid, s, -jnp.inf)

    # Online softmax accumulation.
    m_prev = m_scr[...]                                        # (tq, 1)
    m_new = jnp.maximum(m_prev, jnp.max(s, axis=-1, keepdims=True))
    alpha = jnp.exp(m_prev - m_new)                            # (tq, 1)
    p = jnp.exp(s - m_new)                                     # (tq, tk) f32
    l_scr[...] = alpha * l_scr[...] + jnp.sum(p, axis=-1, keepdims=True)
    acc_scr[...] = alpha * acc_scr[...] + jnp.dot(
        p.astype(v.dtype), v, preferred_element_type=jnp.float32)
    m_scr[...] = m_new

    if num_k_blocks > 1:
        # Stash unnormalized tile probabilities + the max they were taken at.
        col0 = pl.multiple_of(ki * block_k, block_k)
        attn_ref[0, :, pl.ds(col0, block_k)] = p.astype(attn_ref.dtype)
        lane = lax.broadcasted_iota(jnp.int32, mblk_scr.shape, 1)
        mblk_scr[...] = jnp.where(lane == ki, m_new, mblk_scr[...])

    @pl.when(ki == num_k_blocks - 1)
    def _finalize():
        inv_l = pl.reciprocal(l_scr[...], approx=True)         # EUP vrcp (tq,1)
        if num_k_blocks == 1:
            # Single K tile: p was already computed with the final max.
            attn_ref[0] = (p * inv_l).astype(attn_ref.dtype)
        else:
            # Rescale each stored block: exp(m_tile - m_final) * inv_l.
            # Pure VPU muls + nk tiny (tq,1) exps; f32 temp capped at (tq, tk).
            m_fin = m_scr[...]
            for j in range(num_k_blocks):
                cj = j * block_k
                factor = jnp.exp(mblk_scr[:, j:j + 1] - m_fin) * inv_l
                blk = attn_ref[0, :, pl.ds(cj, block_k)].astype(jnp.float32)
                attn_ref[0, :, pl.ds(cj, block_k)] = (blk * factor).astype(
                    attn_ref.dtype)
        ctx_ref[0] = (acc_scr[...] * inv_l).astype(ctx_ref.dtype)


def _vmem_limit_bytes():
    """Chip-aware VMEM request: never ask for the full physical VMEM."""
    cap = 128 * 1024 * 1024
    try:
        info = pltpu.get_tpu_info()
        cap = int(getattr(info, "vmem_capacity_bytes", cap))
    except Exception:
        pass
    return min(64 * 1024 * 1024, (3 * cap) // 4)


def scaled_dot_product_attention(Q, K, V, d_k=None, *, block_q=256, block_k=512,
                                 attn_dtype=None, mxu_dtype=None):
    """Q: [B, H, Lq, d_k], K: [B, H, Lk, d_k], V: [B, H, Lk, d_v].
    Returns (context [B, H, Lq, d_v], attn [B, H, Lq, Lk])."""
    B, H, Lq, Dk = Q.shape
    Lk = K.shape[2]
    Dv = V.shape[-1]
    if d_k is None:
        d_k = Dk
    scale = 1.0 / math.sqrt(d_k)

    out_dtype = Q.dtype
    attn_dtype = jnp.dtype(out_dtype if attn_dtype is None else attn_dtype)
    mm_dtype = jnp.dtype(out_dtype if mxu_dtype is None else mxu_dtype)

    BH = B * H
    Qf = Q.reshape(BH, Lq, Dk)
    Kf = K.reshape(BH, Lk, Dk)
    Vf = V.reshape(BH, Lk, Dv)

    # --- K tiling: keep tk a 128-multiple; pad awkward Lk, mask the tail -----
    if Lk <= block_k:
        tk, nk, Lk_pad = Lk, 1, Lk
    else:
        tk = max(128, (block_k // 128) * 128)
        nk = -(-Lk // tk)
        Lk_pad = nk * tk
    mask_keys = (Lk_pad != Lk)
    if mask_keys:
        pad_k = Lk_pad - Lk
        Kf = jnp.pad(Kf, ((0, 0), (0, pad_k), (0, 0)))
        Vf = jnp.pad(Vf, ((0, 0), (0, pad_k), (0, 0)))

    # --- Q tiling: cap tq so the double-buffered attn slab fits VMEM budget --
    if Lq <= block_q:
        tq = Lq                                  # full-extent block: always legal
    else:
        tq = max(8, (block_q // 8) * 8)
        while tq > 128 and 2 * tq * Lk_pad * attn_dtype.itemsize > 24 * 1024 * 1024:
            tq //= 2
    nq = -(-Lq // tq)
    Lq_pad = nq * tq
    if Lq_pad != Lq:
        Qf = jnp.pad(Qf, ((0, 0), (0, Lq_pad - Lq), (0, 0)))

    kernel = functools.partial(
        _sdpa_kernel, scale=scale, block_k=tk, num_k_blocks=nk,
        lk_valid=Lk, mask_keys=mask_keys, mxu_dtype=mm_dtype)

    grid_spec = pltpu.PrefetchScalarGridSpec(
        num_scalar_prefetch=0,
        grid=(BH, nq, nk),
        in_specs=[
            pl.BlockSpec((1, tq, Dk), lambda b, qi, ki: (b, qi, 0)),
            pl.BlockSpec((1, tk, Dk), lambda b, qi, ki: (b, ki, 0)),
            pl.BlockSpec((1, tk, Dv), lambda b, qi, ki: (b, ki, 0)),
        ],
        out_specs=[
            pl.BlockSpec((1, tq, Dv), lambda b, qi, ki: (b, qi, 0)),
            pl.BlockSpec((1, tq, Lk_pad), lambda b, qi, ki: (b, qi, 0)),
        ],
        scratch_shapes=[
            pltpu.VMEM((tq, Dk), mm_dtype),      # scaled Q (hoisted per qi)
            pltpu.VMEM((tq, 1), jnp.float32),    # running max m
            pltpu.VMEM((tq, 1), jnp.float32),    # running denom l
            pltpu.VMEM((tq, Dv), jnp.float32),   # context accumulator
            pltpu.VMEM((tq, nk), jnp.float32),   # per-K-tile max (rescale)
        ],
    )

    ctx_f, attn_f = pl.pallas_call(
        kernel,
        grid_spec=grid_spec,
        out_shape=(
            jax.ShapeDtypeStruct((BH, Lq_pad, Dv), out_dtype),
            jax.ShapeDtypeStruct((BH, Lq_pad, Lk_pad), attn_dtype),
        ),
        compiler_params=pltpu.CompilerParams(
            dimension_semantics=("parallel", "parallel", "arbitrary"),
            vmem_limit_bytes=_vmem_limit_bytes(),
        ),
    )(Qf, Kf, Vf)

    ctx = ctx_f[:, :Lq, :].reshape(B, H, Lq, Dv)
    attn = attn_f[:, :Lq, :Lk].reshape(B, H, Lq, Lk)
    return ctx, attn


if __name__ == "__main__":
    # --- Test 1: small shapes matching the module's forward signature --------
    B, H, Lq, Lk, Dk, Dv = 2, 4, 8, 8, 16, 16
    key = jax.random.PRNGKey(0)
    kq, kk, kv = jax.random.split(key, 3)
    Q = jax.random.normal(kq, (B, H, Lq, Dk), dtype=jnp.float32)
    K = jax.random.normal(kk, (B, H, Lk, Dk), dtype=jnp.float32)
    V = jax.random.normal(kv, (B, H, Lk, Dv), dtype=jnp.float32)

    context, attn = scaled_dot_product_attention(Q, K, V, d_k=Dk)
    jax.block_until_ready((context, attn))

    scores_ref = jnp.einsum("bhqd,bhkd->bhqk", Q, K) / math.sqrt(Dk)
    attn_ref = jax.nn.softmax(scores_ref, axis=-1)
    ctx_ref = jnp.einsum("bhqk,bhkd->bhqd", attn_ref, V)
    assert jnp.allclose(attn, attn_ref, rtol=2e-3, atol=2e-3), "attn mismatch"
    assert jnp.allclose(context, ctx_ref, rtol=2e-3, atol=2e-3), "context mismatch"

    # --- Test 2: small multi-tile path (K tiling + tail mask + Q padding) ----
    B2, H2, Lq2, Lk2, D2 = 1, 2, 20, 300, 64
    k2q, k2k, k2v = jax.random.split(jax.random.PRNGKey(1), 3)
    Q2 = jax.random.normal(k2q, (B2, H2, Lq2, D2), dtype=jnp.float32)
    K2 = jax.random.normal(k2k, (B2, H2, Lk2, D2), dtype=jnp.float32)
    V2 = jax.random.normal(k2v, (B2, H2, Lk2, D2), dtype=jnp.float32)

    ctx2, attn2 = scaled_dot_product_attention(Q2, K2, V2, block_q=16, block_k=128)
    jax.block_until_ready((ctx2, attn2))

    s2 = jnp.einsum("bhqd,bhkd->bhqk", Q2, K2) / math.sqrt(D2)
    a2 = jax.nn.softmax(s2, axis=-1)
    c2 = jnp.einsum("bhqk,bhkd->bhqd", a2, V2)
    assert jnp.allclose(attn2, a2, rtol=2e-3, atol=2e-3), "attn mismatch (tiled)"
    assert jnp.allclose(ctx2, c2, rtol=2e-3, atol=2e-3), "context mismatch (tiled)"

    print("KERNEL_OK")
</pallas_src>

<mosaic_0001>
module attributes {stable_mosaic.version = 11 : i64} {
  func.func @_sdpa_kernel(%arg0: i32, %arg1: i32, %arg2: i32, %arg3: memref<1x8x16xf32, #tpu.memory_space<vmem>>, %arg4: memref<1x8x16xf32, #tpu.memory_space<vmem>>, %arg5: memref<1x8x16xf32, #tpu.memory_space<vmem>>, %arg6: memref<1x8x16xf32, #tpu.memory_space<vmem>>, %arg7: memref<1x8x8xf32, #tpu.memory_space<vmem>>, %arg8: memref<8x16xf32, #tpu.memory_space<vmem>>, %arg9: memref<8x1xf32, #tpu.memory_space<vmem>>, %arg10: memref<8x1xf32, #tpu.memory_space<vmem>>, %arg11: memref<8x16xf32, #tpu.memory_space<vmem>>, %arg12: memref<8x1xf32, #tpu.memory_space<vmem>>) attributes {dimension_semantics = [#tpu.dimension_semantics<parallel>, #tpu.dimension_semantics<parallel>, #tpu.dimension_semantics<arbitrary>], iteration_bounds = array<i64: 8, 1, 1>, scalar_prefetch = 0 : i64, scratch_operands = 5 : i64, tpu.core_type = #tpu.core_type<tc>, window_params = [{transform_indices = @transform_0, window_bounds = array<i64: 1, 8, 16>}, {transform_indices = @transform_1, window_bounds = array<i64: 1, 8, 16>}, {transform_indices = @transform_2, window_bounds = array<i64: 1, 8, 16>}, {transform_indices = @transform_3, window_bounds = array<i64: 1, 8, 16>}, {transform_indices = @transform_4, window_bounds = array<i64: 1, 8, 8>}]} {
    %c0_i32 = arith.constant 0 : i32
    %0 = arith.cmpi eq, %arg2, %c0_i32 : i32
    %1 = arith.extui %0 : i1 to i32
    %c0_i32_0 = arith.constant 0 : i32
    %2 = arith.cmpi ne, %1, %c0_i32_0 : i32
    scf.if %2 {
      %c0_25 = arith.constant 0 : index
      %c0_26 = arith.constant 0 : index
      %c0_27 = arith.constant 0 : index
      %34 = vector.load %arg3[%c0_25, %c0_26, %c0_27] : memref<1x8x16xf32, #tpu.memory_space<vmem>>, vector<1x8x16xf32>
      %35 = vector.shape_cast %34 : vector<1x8x16xf32> to vector<8x16xf32>
      %cst_28 = arith.constant 2.500000e-01 : f32
      %36 = vector.broadcast %cst_28 : f32 to vector<8x16xf32>
      %37 = arith.mulf %35, %36 : vector<8x16xf32>
      %c0_29 = arith.constant 0 : index
      %c0_30 = arith.constant 0 : index
      %38 = vector.load %arg8[%c0_29, %c0_30] : memref<8x16xf32, #tpu.memory_space<vmem>>, vector<8x16xf32>
      tpu.vector_store %arg8[%c0_29, %c0_30], %37 {strides = array<i32>} : memref<8x16xf32, #tpu.memory_space<vmem>>, vector<8x16xf32>,
      %cst_31 = arith.constant 0xFF800000 : f32
      %39 = vector.broadcast %cst_31 : f32 to vector<8x1xf32>
      %c0_32 = arith.constant 0 : index
      %c0_33 = arith.constant 0 : index
      %40 = vector.load %arg9[%c0_32, %c0_33] : memref<8x1xf32, #tpu.memory_space<vmem>>, vector<8x1xf32>
      tpu.vector_store %arg9[%c0_32, %c0_33], %39 {strides = array<i32>} : memref<8x1xf32, #tpu.memory_space<vmem>>, vector<8x1xf32>,
      %cst_34 = arith.constant 0.000000e+00 : f32
      %41 = vector.broadcast %cst_34 : f32 to vector<8x1xf32>
      %c0_35 = arith.constant 0 : index
      %c0_36 = arith.constant 0 : index
      %42 = vector.load %arg10[%c0_35, %c0_36] : memref<8x1xf32, #tpu.memory_space<vmem>>, vector<8x1xf32>
      tpu.vector_store %arg10[%c0_35, %c0_36], %41 {strides = array<i32>} : memref<8x1xf32, #tpu.memory_space<vmem>>, vector<8x1xf32>,
      %cst_37 = arith.constant 0.000000e+00 : f32
      %43 = vector.broadcast %cst_37 : f32 to vector<8x16xf32>
      %c0_38 = arith.constant 0 : index
      %c0_39 = arith.constant 0 : index
      %44 = vector.load %arg11[%c0_38, %c0_39] : memref<8x16xf32, #tpu.memory_space<vmem>>, vector<8x16xf32>
      tpu.vector_store %arg11[%c0_38, %c0_39], %43 {strides = array<i32>} : memref<8x16xf32, #tpu.memory_space<vmem>>, vector<8x16xf32>,
    } else {
    }
    %c0 = arith.constant 0 : index
    %c0_1 = arith.constant 0 : index
    %3 = vector.load %arg8[%c0, %c0_1] : memref<8x16xf32, #tpu.memory_space<vmem>>, vector<8x16xf32>
    %c0_2 = arith.constant 0 : index
    %c0_3 = arith.constant 0 : index
    %c0_4 = arith.constant 0 : index
    %4 = vector.load %arg4[%c0_2, %c0_3, %c0_4] : memref<1x8x16xf32, #tpu.memory_space<vmem>>, vector<1x8x16xf32>
    %5 = vector.shape_cast %4 : vector<1x8x16xf32> to vector<8x16xf32>
    %c0_5 = arith.constant 0 : index
    %c0_6 = arith.constant 0 : index
    %c0_7 = arith.constant 0 : index
    %6 = vector.load %arg5[%c0_5, %c0_6, %c0_7] : memref<1x8x16xf32, #tpu.memory_space<vmem>>, vector<1x8x16xf32>
    %7 = vector.shape_cast %6 : vector<1x8x16xf32> to vector<8x16xf32>
    %cst = arith.constant dense<0.000000e+00> : vector<8x8xf32>
    %8 = tpu.matmul %3, %5, %cst {dimension_numbers = #tpu.dot_dimension_numbers<[1], [1], [0], [0], [0, 0, 1, 0], [], []>} : vector<8x16xf32>, vector<8x16xf32>, vector<8x8xf32> -> vector<8x8xf32>
    %c0_8 = arith.constant 0 : index
    %c0_9 = arith.constant 0 : index
    %9 = vector.load %arg9[%c0_8, %c0_9] : memref<8x1xf32, #tpu.memory_space<vmem>>, vector<8x1xf32>
    %cst_10 = arith.constant dense<0xFF800000> : vector<8xf32>
    %10 = vector.multi_reduction <maximumf>, %8, %cst_10 [1] : vector<8x8xf32> to vector<8xf32>
    %11 = vector.shape_cast %10 : vector<8xf32> to vector<8x1xf32>
    %12 = arith.maximumf %9, %11 : vector<8x1xf32>
    %13 = arith.subf %9, %12 : vector<8x1xf32>
    %14 = math.exp %13 : vector<8x1xf32>
    %15 = vector.broadcast %12 : vector<8x1xf32> to vector<8x8xf32>
    %16 = arith.subf %8, %15 : vector<8x8xf32>
    %17 = math.exp %16 : vector<8x8xf32>
    %c0_11 = arith.constant 0 : index
    %c0_12 = arith.constant 0 : index
    %18 = vector.load %arg10[%c0_11, %c0_12] : memref<8x1xf32, #tpu.memory_space<vmem>>, vector<8x1xf32>
    %19 = arith.mulf %14, %18 : vector<8x1xf32>
    %cst_13 = arith.constant dense<0.000000e+00> : vector<8xf32>
    %20 = vector.multi_reduction <add>, %17, %cst_13 [1] : vector<8x8xf32> to vector<8xf32>
    %21 = vector.shape_cast %20 : vector<8xf32> to vector<8x1xf32>
    %22 = arith.addf %19, %21 : vector<8x1xf32>
    %c0_14 = arith.constant 0 : index
    %c0_15 = arith.constant 0 : index
    %23 = vector.load %arg10[%c0_14, %c0_15] : memref<8x1xf32, #tpu.memory_space<vmem>>, vector<8x1xf32>
    tpu.vector_store %arg10[%c0_14, %c0_15], %22 {strides = array<i32>} : memref<8x1xf32, #tpu.memory_space<vmem>>, vector<8x1xf32>,
    %c0_16 = arith.constant 0 : index
    %c0_17 = arith.constant 0 : index
    %24 = vector.load %arg11[%c0_16, %c0_17] : memref<8x16xf32, #tpu.memory_space<vmem>>, vector<8x16xf32>
    %25 = vector.broadcast %14 : vector<8x1xf32> to vector<8x16xf32>
    %26 = arith.mulf %25, %24 : vector<8x16xf32>
    %cst_18 = arith.constant dense<0.000000e+00> : vector<8x16xf32>
    %27 = tpu.matmul %17, %7, %cst_18 {dimension_numbers = #tpu.dot_dimension_numbers<[1], [0], [0], [1], [0, 0, 1, 1], [], []>} : vector<8x8xf32>, vector<8x16xf32>, vector<8x16xf32> -> vector<8x16xf32>
    %28 = arith.addf %26, %27 : vector<8x16xf32>
    %c0_19 = arith.constant 0 : index
    %c0_20 = arith.constant 0 : index
    %29 = vector.load %arg11[%c0_19, %c0_20] : memref<8x16xf32, #tpu.memory_space<vmem>>, vector<8x16xf32>
    tpu.vector_store %arg11[%c0_19, %c0_20], %28 {strides = array<i32>} : memref<8x16xf32, #tpu.memory_space<vmem>>, vector<8x16xf32>,
    %c0_21 = arith.constant 0 : index
    %c0_22 = arith.constant 0 : index
    %30 = vector.load %arg9[%c0_21, %c0_22] : memref<8x1xf32, #tpu.memory_space<vmem>>, vector<8x1xf32>
    tpu.vector_store %arg9[%c0_21, %c0_22], %12 {strides = array<i32>} : memref<8x1xf32, #tpu.memory_space<vmem>>, vector<8x1xf32>,
    %c0_i32_23 = arith.constant 0 : i32
    %31 = arith.cmpi eq, %arg2, %c0_i32_23 : i32
    %32 = arith.extui %31 : i1 to i32
    %c0_i32_24 = arith.constant 0 : i32
    %33 = arith.cmpi ne, %32, %c0_i32_24 : i32
    scf.if %33 {
      %c0_25 = arith.constant 0 : index
      %c0_26 = arith.constant 0 : index
      %34 = vector.load %arg10[%c0_25, %c0_26] : memref<8x1xf32, #tpu.memory_space<vmem>>, vector<8x1xf32>
      %35 = tpu.reciprocal %34 {approx = true} : vector<8x1xf32> -> vector<8x1xf32>
      %36 = vector.broadcast %35 : vector<8x1xf32> to vector<8x8xf32>
      %37 = arith.mulf %17, %36 : vector<8x8xf32>
      %c0_27 = arith.constant 0 : index
      %c0_28 = arith.constant 0 : index
      %c0_29 = arith.constant 0 : index
      %38 = vector.load %arg7[%c0_27, %c0_28, %c0_29] : memref<1x8x8xf32, #tpu.memory_space<vmem>>, vector<1x8x8xf32>
      %39 = vector.shape_cast %38 : vector<1x8x8xf32> to vector<8x8xf32>
      %40 = vector.shape_cast %37 : vector<8x8xf32> to vector<1x8x8xf32>
      tpu.vector_store %arg7[%c0_27, %c0_28, %c0_29], %40 {strides = array<i32>} : memref<1x8x8xf32, #tpu.memory_space<vmem>>, vector<1x8x8xf32>,
      %c0_30 = arith.constant 0 : index
      %c0_31 = arith.constant 0 : index
      %41 = vector.load %arg11[%c0_30, %c0_31] : memref<8x16xf32, #tpu.memory_space<vmem>>, vector<8x16xf32>
      %42 = vector.broadcast %35 : vector<8x1xf32> to vector<8x16xf32>
      %43 = arith.mulf %41, %42 : vector<8x16xf32>
      %c0_32 = arith.constant 0 : index
      %c0_33 = arith.constant 0 : index
      %c0_34 = arith.constant 0 : index
      %44 = vector.load %arg6[%c0_32, %c0_33, %c0_34] : memref<1x8x16xf32, #tpu.memory_space<vmem>>, vector<1x8x16xf32>
      %45 = vector.shape_cast %44 : vector<1x8x16xf32> to vector<8x16xf32>
      %46 = vector.shape_cast %43 : vector<8x16xf32> to vector<1x8x16xf32>
      tpu.vector_store %arg6[%c0_32, %c0_33, %c0_34], %46 {strides = array<i32>} : memref<1x8x16xf32, #tpu.memory_space<vmem>>, vector<1x8x16xf32>,
    } else {
    }
    return
  }
  func.func @transform_0(%arg0: i32, %arg1: i32, %arg2: i32) -> (i32, i32, i32) {
    %c0_i32 = arith.constant 0 : i32
    %c0_i32_0 = arith.constant 0 : i32
    return %arg0, %arg1, %c0_i32 : i32, i32, i32
  }
  func.func @transform_1(%arg0: i32, %arg1: i32, %arg2: i32) -> (i32, i32, i32) {
    %c0_i32 = arith.constant 0 : i32
    %c0_i32_0 = arith.constant 0 : i32
    return %arg0, %arg2, %c0_i32 : i32, i32, i32
  }
  func.func @transform_2(%arg0: i32, %arg1: i32, %arg2: i32) -> (i32, i32, i32) {
    %c0_i32 = arith.constant 0 : i32
    %c0_i32_0 = arith.constant 0 : i32
    return %arg0, %arg2, %c0_i32 : i32, i32, i32
  }
  func.func @transform_3(%arg0: i32, %arg1: i32, %arg2: i32) -> (i32, i32, i32) {
    %c0_i32 = arith.constant 0 : i32
    %c0_i32_0 = arith.constant 0 : i32
    return %arg0, %arg1, %c0_i32 : i32, i32, i32
  }
  func.func @transform_4(%arg0: i32, %arg1: i32, %arg2: i32) -> (i32, i32, i32) {
    %c0_i32 = arith.constant 0 : i32
    %c0_i32_0 = arith.constant 0 : i32
    return %arg0, %arg1, %c0_i32 : i32, i32, i32
  }
}

</mosaic_0001>

<bundles_post_ra>
// kernel: tpu_custom_call.1
= control target key start
LH: loop header
LB: loop body
LE: loop exit
PB: predicated region body
PF: predicated region fallthrough
CT: control target
= control target key end

     0   :  { %s1415_s0 = inlined_call_operand.hbm [shape: f32[8,8,16], index: 0, kind: input, shape index: {}]   ;;  %s1416_s1 = inlined_call_operand.hbm [shape: f32[8,8,16], index: 1, kind: input, shape index: {}]   ;;  %s1417_s2 = inlined_call_operand.hbm [shape: f32[8,8,16], index: 2, kind: input, shape index: {}]   ;;  %s1418_s3 = inlined_call_operand.hbm [shape: f32[8,8,16], index: 3, kind: output, shape index: {0}]   ;;  %s1419_s4 = inlined_call_operand.hbm [shape: f32[8,8,8], index: 4, kind: output, shape index: {1}]  }
   0x1   :  { %1427 = sst [smem:[#allocation24_spill]] %s1416_s1 }
   0x2   :  { %10 = vsyncpa [#allocation8], 0 }
   0x3   :  { %12 = vsyncpa [#allocation8 + $0x1], 0 }
   0x4   :  { %13 = vsyncpa [#allocation11], 0 }
   0x5   :  { %15 = vsyncpa [#allocation11 + $0x1], 0 }
   0x6   :  { %16 = vsyncpa [#allocation9], 0 }
   0x7   :  { %18 = vsyncpa [#allocation9 + $0x1], 0 }
   0x8   :  { %19 = vsyncpa [#allocation15], 0 }
   0x9   :  { %21 = vsyncpa [#allocation15 + $0x1], 0  ;;  %s1109_s15 = smov 0   ;;  %s1111_s16 = smov 0  }
   0xa   :  { %s1113_s17 = smov 0   ;;  %s1115_s18 = smov 0  }
   0xb   :  { %s1117_s19 = smov 0   ;;  %s1119_s20 = smov 0  }
   0xc LB: > { %1428 = sst [smem:[#allocation20_spill]] %s1069_s19  ;;  %s1140_s21 = sadd.s32 4294967295, %s1073_s20   ;;  %s1073_s20 = sphi %s1119_s20, %s27_s20   ;;  %s1069_s19 = sphi %s1117_s19, %s1451_s19   ;;  %s1065_s18 = sphi %s1115_s18, %s1450_s18   ;;  %s1061_s17 = sphi %s1113_s17, %s1454_s17   ;;  %s1057_s16 = sphi %s1111_s16, %s1453_s16   ;;  %s1053_s15 = sphi %s1109_s15, %s1452_s15  }
   0xd   : > { %s738_s22 = sadd.s32 4294967294, %s1073_s20   ;;  %s46_s23 = sadd.s32 1, %s1069_s19 }
   0xe   : > { %s55_s24 = sadd.s32 1, %s1061_s17  ;;  %p48_p0 = scmp.ge.s32.totalorder %s46_s23, 8 }
   0xf   : > { %p62_p1 = scmp.ne.s32.totalorder %s1061_s17, %s1057_s16  ;;  %p63_p2 = scmp.eq.s32.totalorder %s1073_s20, 0 }
  0x10   : > { %p68_p3 = scmp.ne.s32.totalorder %s1057_s16, %s1053_s15  ;;  %s1456_s23 = smov (%p48_p0, %s46_s23), 0 }
  0x11   : > { %1429 = sst [smem:[#allocation21_spill]] %s1456_s23  ;;  %p1152_p4 = por %p63_p2, %p62_p1 }
  0x12   : > { %p69_p5 = scmp.eq.s32.totalorder %s1140_s21, 0  ;;  %s50_s26 = ssub.s32 %s1069_s19, %s1456_s23 }
  0x13   : > { %p150_p6 = scmp.eq.s32.totalorder %s1140_s21, 7  ;;  %p53_p7 = scmp.eq.s32.totalorder %s50_s26, 0 }
  0x14   : > { %p1160_p8 = por %p69_p5, %p68_p3  ;;  %p156_p10 = scmp.eq.s32.totalorder %s738_s22, 7 }
  0x15   : > { %p1164_p9 = por %p150_p6, %p62_p1  ;;  %p803_p12 = scmp.lt.s32.totalorder %s1073_s20, 8 }
  0x16   : > { %s1431_s27 = scalar_select %p1160_p8, 1, 0 }
  0x17   : > { %s1432_s28 = scalar_select %p1164_p9, 1, 0 }
  0x18   : > { %s1169_s29 = scalar_select %p53_p7, %s1061_s17, %s55_s24  }
  0x19   : > { %p1171_p11 = por %p156_p10, %p68_p3  ;;  %s1420_s5 = sand.u32 1, %s1061_s17  }
  0x1a   : > { %1433 = sst [smem:[#allocation22_spill]] %s1169_s29  ;;  %s1179_s6 = sshll.u32 %s1420_s5, 3 }
  0x1b   : > { %s1434_s30 = scalar_select %p1171_p11, 1, 0 }
  0x1c   : > { %s1182_s7 = sshll.u32 %s1069_s19, 7  ;;  %p1186_p13 = pnand %p803_p12, %p1152_p4 }
  0x1d   : > { %1435 = sst [smem:[#allocation23_spill]] %s1434_s30  ;;  %s223_s9 = sand.u32 1, %s1073_s20  }
  0x1e   : > { %s1436_s8 = scalar_select %p1186_p13, 1, 0 }
  0x1f   : > { %s1437_s1 = sld [smem:[#allocation24_spill]]  ;;  %s227_s13 = scalar_lea.vmem [#allocation10], %s1179_s6 }
  0x20   : > { %s235_s14 = sshll.u32 %s227_s13, 4  ;;  %s1202_s22 = scalar_lea.sflag [#allocation11], %s223_s9  ;;  %s1199_s14 = int_to_ptr.vmem [resolvable:$true] %s235_s14 }
  0x21   : > { %p1208_p3 = pneg %p1186_p13 }
  0x25   : > { %s1195_s12 = scalar_lea.hbm %s1437_s1, %s1182_s7  ;;  %s870_s11 = scalar_lea.hbm %s1437_s1, 1024 }
  0x26   : > { %s865_s24 = scalar_lea.hbm %s1195_s12, 128  ;;  %p871_p6 = scmp.lt.u32.totalorder %s1195_s12, %s1437_s1 }
  0x27   : > { %p866_p2 = scmp.ne.s32.totalorder %s1195_s12, %s865_s24  ;;  %p872_p7 = scmp.lt.u32.totalorder %s870_s11, %s865_s24 }
  0x28   : > { %p874_p12 = scmp.lt.u32.totalorder %s865_s24, %s1195_s12 }
  0x29   : > { %p868_p4 = pnand %p1208_p3, %p866_p2  ;;  %p873_p10 = por %p872_p7, %p871_p6 }
  0x2b   : > { %p869_p5 = pneg %p868_p4  ;;  %p875_p0 = por %p874_p12, %p873_p10 }
  0x2d   : > { %p876_p1 = pnand %p875_p0, %p869_p5 }
  0x2f   : > { %879 = shalt.err (!%p876_p1)
}
  0x30   : > { %s880_s9 = scalar_lea.vmem %s1199_s14, 128  ;;  %s1075_s26 = smov [#allocation10]  }
  0x31   : > { %p881_p2 = scmp.ne.s32.totalorder %s1199_s14, %s880_s9  ;;  %s885_s10 = sshll.u32 %s1075_s26, 4  ;;  %s886_s10 = int_to_ptr.vmem [resolvable:$false] %s885_s10 }
  0x32   : > { %s887_s5 = scalar_lea.vmem %s886_s10, 256  ;;  %p888_p9 = scmp.lt.s32.totalorder %s1199_s14, %s886_s10 }
  0x33   : > { %p883_p4 = pnand %p881_p2, %p1208_p3  ;;  %p889_p8 = scmp.lt.s32.totalorder %s887_s5, %s880_s9 }
  0x35   : > { %p884_p11 = pneg %p883_p4  ;;  %p890_p6 = por %p889_p8, %p888_p9 }
  0x37   : > { %p891_p7 = pnand %p890_p6, %p884_p11 }
  0x39   : > { %894 = shalt.err (!%p891_p7)
}
  0x3a   : > { %792 = dma.hbm_to_vmem [thread:$0]  (!%p1186_p13), %s1195_s12, 128, %s1199_s14, %s1202_s22  }
  0x3b   : > { %p1439_p0 = scmp.lt.s32.totalorder %s1073_s20, 9  ;;  %p1440_p1 = scmp.ge.s32.totalorder %s1073_s20, 1 }
  0x3c   : > { %s1244_s9 = scalar_lea.hbm %s1415_s0, %s1182_s7  ;;  %s208_s26 = scalar_lea.vmem [#allocation7], %s1179_s6 }
  0x3d   : > { %p1236_p5 = pnand %p1440_p1, %p1439_p0  ;;  %s216_s10 = sshll.u32 %s208_s26, 4  ;;  %s1247_s10 = int_to_ptr.vmem [resolvable:$true] %s216_s10 }
  0x3e   : > { %s1253_s5 = scalar_lea.hbm %s1417_s2, %s1182_s7  ;;  %s1442_s1 = sand.u32 1, %s1061_s17  }
  0x3f   : > { %s1441_s24 = scalar_select %p1236_p5, 1, 0 }
  0x40   : > { %s205_s23 = scalar_lea.sflag [#allocation8], %s1442_s1  ;;  %s895_s19 = scalar_lea.hbm %s1244_s9, 128 }
  0x41   : > { %p896_p8 = scmp.ne.s32.totalorder %s1244_s9, %s895_s19  ;;  %s900_s29 = scalar_lea.hbm %s1415_s0, 1024 }
  0x42   : > { %p901_p10 = scmp.lt.u32.totalorder %s1244_s9, %s1415_s0  ;;  %p902_p12 = scmp.lt.u32.totalorder %s900_s29, %s895_s19 }
  0x43   : > { %p898_p9 = pnand %p896_p8, %p1208_p3  ;;  %p904_p4 = scmp.lt.u32.totalorder %s895_s19, %s1244_s9 }
  0x44   : > { %p903_p2 = por %p902_p12, %p901_p10 }
  0x45   : > { %p899_p11 = pneg %p898_p9 }
  0x46   : > { %p905_p6 = por %p904_p4, %p903_p2 }
  0x48   : > { %p906_p7 = pnand %p905_p6, %p899_p11 }
  0x4a   : > { %909 = shalt.err (!%p906_p7)
}
  0x4b   : > { %s910_s1 = scalar_lea.vmem %s1247_s10, 128  ;;  %s1076_s7 = smov [#allocation7]  }
  0x4c   : > { %p911_p0 = scmp.ne.s32.totalorder %s1247_s10, %s910_s1  ;;  %s915_s12 = sshll.u32 %s1076_s7, 4  ;;  %s916_s12 = int_to_ptr.vmem [resolvable:$false] %s915_s12 }
  0x4d   : > { %s917_s30 = scalar_lea.vmem %s916_s12, 256  ;;  %p918_p9 = scmp.lt.s32.totalorder %s1247_s10, %s916_s12 }
  0x4e   : > { %p913_p1 = pnand %p911_p0, %p1208_p3  ;;  %p919_p5 = scmp.lt.s32.totalorder %s917_s30, %s910_s1 }
  0x50   : > { %p914_p8 = pneg %p913_p1  ;;  %p920_p10 = por %p919_p5, %p918_p9 }
  0x52   : > { %p921_p12 = pnand %p920_p10, %p914_p8 }
  0x54   : > { %924 = shalt.err (!%p921_p12)
}
  0x55   : > { %789 = dma.hbm_to_vmem [thread:$0]  (!%p1186_p13), %s1244_s9, 128, %s1247_s10, %s205_s23  }
  0x56   : > { %s246_s19 = scalar_lea.vmem [#allocation12], %s1179_s6  ;;  %s925_s14 = scalar_lea.hbm %s1253_s5, 128 }
  0x57   : > { %s254_s29 = sshll.u32 %s246_s19, 4  ;;  %p926_p11 = scmp.ne.s32.totalorder %s1253_s5, %s925_s14  ;;  %s255_s29 = int_to_ptr.vmem [resolvable:$true] %s254_s29 }
  0x58   : > { %s930_s26 = scalar_lea.hbm %s1417_s2, 1024  ;;  %p931_p4 = scmp.lt.u32.totalorder %s1253_s5, %s1417_s2 }
  0x59   : > { %p928_p5 = pnand %p926_p11, %p1208_p3  ;;  %p932_p6 = scmp.lt.u32.totalorder %s930_s26, %s925_s14 }
  0x5a   : > { %p934_p0 = scmp.lt.u32.totalorder %s925_s14, %s1253_s5 }
  0x5b   : > { %p929_p2 = pneg %p928_p5  ;;  %p933_p7 = por %p932_p6, %p931_p4 }
  0x5d   : > { %p935_p1 = por %p934_p0, %p933_p7 }
  0x5f   : > { %p936_p8 = pnand %p935_p1, %p929_p2 }
  0x61   : > { %939 = shalt.err (!%p936_p8)
}
  0x62   : > { %s940_s23 = scalar_lea.vmem %s255_s29, 128  ;;  %s1077_s6 = smov [#allocation12]  }
  0x63   : > { %p941_p9 = scmp.ne.s32.totalorder %s255_s29, %s940_s23  ;;  %s945_s9 = sshll.u32 %s1077_s6, 4  ;;  %s946_s9 = int_to_ptr.vmem [resolvable:$false] %s945_s9 }
  0x64   : > { %s947_s10 = scalar_lea.vmem %s946_s9, 256  ;;  %p948_p11 = scmp.lt.s32.totalorder %s255_s29, %s946_s9 }
  0x65   : > { %p943_p10 = pnand %p941_p9, %p1208_p3  ;;  %p949_p5 = scmp.lt.s32.totalorder %s947_s10, %s940_s23 }
  0x67   : > { %p944_p12 = pneg %p943_p10  ;;  %p950_p13 = por %p949_p5, %p948_p11 }
  0x69   : > { %p951_p4 = pnand %p950_p13, %p944_p12 }
  0x6b   : > { %954 = shalt.err (!%p951_p4)
}
  0x6c   : > { %p1443_p6 = scmp.ne.s32.totalorder %s1436_s8, 0  ;;  %p1444_p2 = scmp.ne.s32.totalorder %s1441_s24, 0 }
  0x6d   : > { %s1300_s25 = sand.u32 (!%p1444_p2), 1, %s1057_s16   ;;  %p1445_p13 = scmp.ne.s32.totalorder (!%p1444_p2), %s1431_s27, 0 }
  0x6e   : > { %795 = dma.hbm_to_vmem [thread:$0]  (!%p1443_p6), %s1253_s5, 128, %s255_s29, %s1202_s22  }
  0x6f   : > { %263 = sbr.rel (%p1444_p2) target bundleno = 965 (0x3c5), region = 32  ;;  %s1303_s12 = sshll.u32 (!%p1444_p2), %s1300_s25, 3 }
  0x70   : > { %s266_s30 = scalar_lea.sflag (!%p1444_p2), [#allocation8], %s1300_s25  ;;  %s269_s19 = scalar_lea.vmem (!%p1444_p2), [#allocation7], %s1303_s12 }
  0x76   : > { %1036 = dma.done.wait (%p1445_p13), %s266_s30, 128  }
  0x77   : > { %1038 = vsyncadd (%p1445_p13), %s266_s30, 4294967168  ;;  %s274_s8 = sand.u32 1, %s1140_s21   ;;  %s278_s24 = scalar_lea.vmem [#allocation10], %s1303_s12 }
  0x78   : > { %s275_s22 = scalar_lea.sflag [#allocation11], %s274_s8 }
  0x79   : > { %1040 = dma.done.wait (%p1445_p13), %s275_s22, 256  }
  0x7a   : > { %1042 = vsyncadd (%p1445_p13), %s275_s22, 4294967040  ;;  %vm333_vm0 = vcmask 130048   ;;  %v1078_v0 = vmov 0.0   ;;  %vm1079_vm1 = vmmov 0   ;;  %v331_v1 = vld [vmem:[%s269_s19] sm:$0xff]  ;;  %v340_v2 = vld [vmem:[%s278_s24] sm:$0xff] }
  0x7b   : > { %766 = vmatprep.subr.mxu0 %v1078_v0  ;;  %338 = vst.msk [vmem:[#allocation5] sm:$0xff] %vm333_vm0, %v1078_v0  ;;  %768 = vmatprep.mubr.msk.f32.mxu0 %vm1079_vm1, %v1078_v0  ;;  %v332_v3 = vmul.f32 0.25, %v331_v1  ;;  %vm335_vm2 = vcmask 7168   ;;  %v1080_v5 = vmov -inf   ;;  %vm420_vm3 = vcmask 64512   ;;  %s287_s21 = scalar_lea.vmem [#allocation12], %s1303_s12 }
  0x7c   : > { %771 = vmatprep.subr.mxu1 %v1078_v0  ;;  %773 = vmatprep.mubr.msk.f32.mxu1 %vm1079_vm1, %v1078_v0  ;;  %336 = vst.msk [vmem:[#allocation3] sm:$0xff] %vm335_vm2, %v1080_v5  ;;  %337 = vst.msk [vmem:[#allocation4] sm:$0xff] %vm335_vm2, %v1078_v0  ;;  %v1081_v9 = vmov 0   ;;  %v341_v14 = vld [vmem:[%s287_s21] sm:$0xff]  ;;  %s758_s27 = sshll.u32 %s1065_s18, 7  ;;  %s319_s5 = scalar_lea.vmem [#allocation13], %s1303_s12 }
  0x7d   : > { %767 = vmatpush3.xpose.msk.msra.mxu0 %vm333_vm0, %v340_v2  ;;  %334 = vst.msk [vmem:[#allocation2] sm:$0xff] %vm333_vm0, %v332_v3  ;;  %857 = vset.pattern.permute.xlu0 %v1081_v9  ;;  %s562_s29 = sshll.u32 %s319_s5, 4  ;;  %s326_s14 = scalar_lea.vmem [#allocation14], %s1303_s12  ;;  %s1338_s29 = int_to_ptr.vmem [resolvable:$true] %s562_s29 }
  0x7e   : > { %858 = vset.pattern.permute.xlu1 %v1081_v9  ;;  %772 = vmatpush3.msra.mxu1 %v341_v14  ;;  %s576_s11 = sshll.u32 %s326_s14, 4  ;;  %s1336_s1 = scalar_lea.hbm %s1418_s3, %s758_s27  ;;  %s1345_s11 = int_to_ptr.vmem [resolvable:$true] %s576_s11 }
  0x7f   : > { %s1343_s18 = scalar_lea.hbm %s1419_s4, %s758_s27  ;;  %s543_s6 = scalar_lea.sflag [#allocation9], %s1300_s25 }
  0x80   : > { %s955_s9 = scalar_lea.vmem %s1338_s29, 128  ;;  %p1446_p7 = scmp.ne.s32.totalorder %s1432_s28, 0 }
  0x81   : > { %p956_p3 = scmp.ne.s32.totalorder %s1338_s29, %s955_s9  ;;  %s1082_s10 = smov [#allocation13]  }
  0x82   : > { %v444_v28 = vld [vmem:[#allocation5] sm:$0xff]  ;;  %s959_s12 = sshll.u32 %s1082_s10, 4  ;;  %s960_s12 = int_to_ptr.vmem [resolvable:$false] %s959_s12 }
  0x83   : > { %v419_v10 = vld [vmem:[#allocation3] sm:$0xff]  ;;  %v436_v22 = vld [vmem:[#allocation4] sm:$0xff]  ;;  %p957_p0 = pnand %p956_p3, %p1446_p7  ;;  %s961_s30 = scalar_lea.vmem %s960_s12, 256 }
  0x84   : > { %v339_v4 = vld [vmem:[#allocation2] sm:$0xff]  ;;  %p962_p8 = scmp.lt.s32.totalorder %s1338_s29, %s960_s12  ;;  %p963_p9 = scmp.lt.s32.totalorder %s961_s30, %s955_s9 }
  0x85   : > { %769 = vmatmul.mubr.msk.f32.vlgmr.msra.gmra.mrb[0].mxu0 %vm333_vm0, %v339_v4  ;;  %p958_p1 = pneg %p957_p0 }
  0x86   : > { %p964_p10 = por %p963_p9, %p962_p8 }
  0x88   : > { %p965_p12 = pnand %p964_p10, %p958_p1 }
 0x158   : > { %v415_v6 = vpop.f32.mrb[0].mxu0 }
 0x159   : > { %v770_v7 = vpop.f32.mrb[1].mxu0  ;;  %v421_v8 = vsel %vm420_vm3, %v415_v6, -inf }
 0x15a   : > { %422 = vmax.xlane.f32.xlu0 %v421_v8 }
 0x1e7   : > { %v423_v11 = vpop.xlane.xlu0 %422 }
 0x1e8   : > { %v424_v12 = vmax.f32 %v419_v10, %v423_v11 }
 0x1ea   : > { %v425_v13 = vsub.f32 %v419_v10, %v424_v12  ;;  %526 = vst.msk [vmem:[#allocation3] sm:$0xff] %vm335_vm2, %v424_v12  ;;  %430 = vperm.xlu0 %857, %v424_v12  }
 0x1ec   : > { %v426_v20 = vmul.f32 1.442695, %v425_v13 }
 0x269   : > { %v431_v15 = vpop.permute.xlu0 %430 }
 0x26a   : > { %v433_v16 = vsub.f32 %v415_v6, %v431_v15 }
 0x26c   : > { %v434_v17 = vmul.f32 1.442695, %v433_v16 }
 0x26e   : > { %859 = vpow2.f32 %v434_v17 }
 0x26f   : > { %861 = vpow2.f32 %v426_v20 }
 0x278   : > { %v860_v18 = vpop.eup %859 }
 0x279   : > { %774 = vmatmul.mubr.msk.f32.vlgmr.msra.gmra.mrb[0].mxu1 %vm420_vm3, %v860_v18  ;;  %v438_v19 = vsel %vm420_vm3, %v860_v18, 0.0  ;;  %v862_v21 = vpop.eup %861 }
 0x27a   : > { %439 = vadd.xlane.f32.xlu1 %v438_v19  ;;  %v437_v23 = vmul.f32 %v862_v21, %v436_v22 }
 0x28b   : > { %447 = vperm.xlu1 %858, %v862_v21  }
 0x307   : > { %v440_v24 = vpop.xlane.xlu1 %439 }
 0x308   : > { %v441_v25 = vadd.f32 %v440_v24, %v437_v23 }
 0x30a   : > { %443 = vst.msk [vmem:[#allocation4] sm:$0xff] %vm335_vm2, %v441_v25 }
 0x30b   : > { %v448_v29 = vpop.permute.xlu1 %447 }
 0x30c   : > { %v450_v30 = vmul.f32 %v448_v29, %v444_v28 }
 0x311   : > { %v530_v26 = vld [vmem:[#allocation4] sm:$0xff] }
 0x312   : > { %863 = vrcp.f32 %v530_v26 }
 0x31c   : > { %v864_v27 = vpop.eup %863 }
 0x31d   : > { %534 = vperm.xlu1 %858, %v864_v27  }
 0x34c   : > { %v520_v31 = vpop.f32.mrb[0].mxu1 }
 0x34d   : > { %v524_v32 = vadd.f32 %v520_v31, %v450_v30  ;;  %v775_v33 = vpop.f32.mrb[1].mxu1 }
 0x34f   : > { %525 = vst.msk [vmem:[#allocation5] sm:$0xff] %vm333_vm0, %v524_v32 }
 0x356   : > { %v539_v34 = vld [vmem:[#allocation5] sm:$0xff] }
 0x39c   : > { %v535_v35 = vpop.permute.xlu1 %534 }
 0x39d   : > { %v537_v36 = vmul.f32 %v860_v18, %v535_v35  ;;  %v540_v37 = vmul.f32 %v539_v34, %v535_v35 }
 0x39f   : > { %541 = vst.msk [vmem:[%s319_s5] sm:$0xff] %vm333_vm0, %v540_v37 }
 0x3a0   : > { %538 = vst.msk [vmem:[%s326_s14] sm:$0xff] %vm420_vm3, %v537_v36 }
 0x3a1   : > { %968 = shalt.err (!%p965_p12)
}
 0x3a2   : > { %s969_s19 = scalar_lea.hbm %s1336_s1, 128  ;;  %s973_s24 = scalar_lea.hbm %s1418_s3, 1024 }
 0x3a3   : > { %p970_p11 = scmp.ne.s32.totalorder %s1336_s1, %s969_s19  ;;  %p974_p6 = scmp.lt.u32.totalorder %s1336_s1, %s1418_s3 }
 0x3a4   : > { %p975_p2 = scmp.lt.u32.totalorder %s973_s24, %s969_s19  ;;  %p977_p3 = scmp.lt.u32.totalorder %s969_s19, %s1336_s1 }
 0x3a5   : > { %p971_p5 = pnand %p970_p11, %p1446_p7 }
 0x3a6   : > { %p976_p13 = por %p975_p2, %p974_p6 }
 0x3a7   : > { %p972_p4 = pneg %p971_p5 }
 0x3a8   : > { %p978_p0 = por %p977_p3, %p976_p13 }
 0x3aa   : > { %p979_p1 = pnand %p978_p0, %p972_p4 }
 0x3ac   : > { %982 = shalt.err (!%p979_p1)
}
 0x3ad   : > { %782 = dma.vmem_to_hbm [thread:$0]  (%p1446_p7), %s1338_s29, 128, %s1336_s1, %s543_s6  }
 0x3ae   : > { %s548_s5 = scalar_lea.sflag [#allocation15], %s1300_s25  ;;  %s983_s14 = scalar_lea.vmem %s1345_s11, 128 }
 0x3af   : > { %p984_p8 = scmp.ne.s32.totalorder %s1345_s11, %s983_s14  ;;  %s1083_s13 = smov [#allocation14]  }
 0x3b0   : > { %s987_s26 = sshll.u32 %s1083_s13, 4  ;;  %s988_s26 = int_to_ptr.vmem [resolvable:$false] %s987_s26 }
 0x3b1   : > { %p985_p9 = pnand %p984_p8, %p1446_p7  ;;  %s989_s7 = scalar_lea.vmem %s988_s26, 256 }
 0x3b2   : > { %p990_p12 = scmp.lt.s32.totalorder %s1345_s11, %s988_s26  ;;  %p991_p11 = scmp.lt.s32.totalorder %s989_s7, %s983_s14 }
 0x3b3   : > { %p986_p10 = pneg %p985_p9 }
 0x3b4   : > { %p992_p5 = por %p991_p11, %p990_p12 }
 0x3b6   : > { %p993_p4 = pnand %p992_p5, %p986_p10 }
 0x3b8   : > { %996 = shalt.err (!%p993_p4)
}
 0x3b9   : > { %s997_s25 = scalar_lea.hbm %s1343_s18, 128  ;;  %s1001_s23 = scalar_lea.hbm %s1419_s4, 1024 }
 0x3ba   : > { %p998_p6 = scmp.ne.s32.totalorder %s1343_s18, %s997_s25  ;;  %p1002_p3 = scmp.lt.u32.totalorder %s1343_s18, %s1419_s4 }
 0x3bb   : > { %p1003_p0 = scmp.lt.u32.totalorder %s1001_s23, %s997_s25  ;;  %p1005_p8 = scmp.lt.u32.totalorder %s997_s25, %s1343_s18 }
 0x3bc   : > { %p999_p2 = pnand %p998_p6, %p1446_p7 }
 0x3bd   : > { %p1004_p1 = por %p1003_p0, %p1002_p3 }
 0x3be   : > { %p1000_p13 = pneg %p999_p2 }
 0x3bf   : > { %p1006_p9 = por %p1005_p8, %p1004_p1 }
 0x3c1   : > { %p1007_p10 = pnand %p1006_p9, %p1000_p13 }
 0x3c3   : > { %1010 = shalt.err (!%p1007_p10)
}
 0x3c4   : > { %783 = dma.vmem_to_hbm [thread:$0]  (%p1446_p7), %s1345_s11, 128, %s1343_s18, %s548_s5  }
 0x3c5 PF: > { %s1447_s10 = sld [smem:[#allocation23_spill]]  ;;  %p804_p12 = scmp.ge.s32.totalorder %s1073_s20, 2 }
 0x3c6   : > { %s588_s12 = sand.u32 1, %s1053_s15  }
 0x3c7   : > { %s589_s30 = scalar_lea.sflag [#allocation9], %s588_s12 }
 0x3cb   : > { %p1448_p11 = scmp.ne.s32.totalorder %s1447_s10, 0 }
 0x3cd   : > { %p797_p5 = pnand %p804_p12, %p1448_p11 }
 0x3cf   : > { %1044 = dma.done.wait (!%p797_p5), %s589_s30, 128  }
 0x3d0   : > { %1046 = vsyncadd (!%p797_p5), %s589_s30, 4294967168  ;;  %s598_s19 = scalar_lea.sflag [#allocation15], %s588_s12 }
 0x3d1   : > { %1048 = dma.done.wait (!%p797_p5), %s598_s19, 128  }
 0x3d2   : > { %1050 = vsyncadd (!%p797_p5), %s598_s19, 4294967168  ;;  %s27_s20 = sadd.s32 1, %s1073_s20   ;;  %s1449_s28 = sld [smem:[#allocation22_spill]] }
 0x3d3   : > { %p24_p4 = scmp.ge.s32.totalorder %s27_s20, 10   ;;  %s1450_s18 = sld [smem:[#allocation20_spill]] }
 0x3d4   : > { %s1451_s19 = sld [smem:[#allocation21_spill]]  ;;  %s1452_s15 = smov %s1057_s16 }
 0x3d5   : > { %s1453_s16 = smov %s1061_s17  ;;  %26 = sbr.rel (!%p24_p4) target bundleno = 12 (0xc), region = 126 }
 0x3d8   : > { %s1454_s17 = smov %s1449_s28 }
 0x3dc   :  { %603 = vsyncpa [#allocation8], 1 }
 0x3dd   :  { %605 = vsyncpa [#allocation8 + $0x1], 1 }
 0x3de   :  { %606 = vsyncpa [#allocation11], 1 }
 0x3df   :  { %608 = vsyncpa [#allocation11 + $0x1], 1 }
 0x3e0   :  { %609 = vsyncpa [#allocation9], 1 }
 0x3e1   :  { %611 = vsyncpa [#allocation9 + $0x1], 1 }
 0x3e2   :  { %612 = vsyncpa [#allocation15], 1 }
 0x3e3   :  { %614 = vsyncpa [#allocation15 + $0x1], 1 }

</bundles_post_ra>
